<compile_context>
chip_gen: v6e
topology: v6e:2x2x1
jax: 0.10.0
libtpu: 0.0.40
codegen_flags: <defaults>
</compile_context>

<pallas_src>
import jax
import jax.numpy as jnp
from jax.experimental import pallas as pl
from jax.experimental.pallas import tpu as pltpu

C = 45              # 3 anchors x 15 channels (10 cls + 2 xy + 2 wh + 1 conf)
H = 16
W = 16
HW = H * W          # 256 -> lane-dense (2 x 128)
N_ANCHOR = 3
C_PER_ANCHOR = 15

COORD_COEF = 5.0
NOOBJ_COEF = 0.5
OBJ_COEF = 5.0
CLS_COEF = 1.0

_NEG_BIG = -1e30    # finite "-inf" fill (exp underflows to exactly 0)


def anchor_loss_kernel(pred_ref, tgt_ref, out_ref):
    # pred_ref / tgt_ref: (3, 15, 256) f32 in VMEM; out_ref: (1, 1) f32 in SMEM.
    pred = pred_ref[...]                                    # (3, 15, 256)
    tgt = tgt_ref[...]                                      # (3, 15, 256)
    conf = tgt_ref[:, 14:15, :]                             # (3, 1, 256) object mask

    ch = jax.lax.broadcasted_iota(jnp.int32, pred.shape, 1)  # channel idx (sublane)
    is_cls = ch < 10                                         # class channels 0..9
    is_conf = ch == 14                                       # confidence channel

    # One EUP sigmoid pass over the whole slab (used for xy/wh/conf channels).
    sig = jax.nn.sigmoid(pred)

    # Masked softmax over the 10 class channels (sublane axis), exact reciprocal.
    m = jnp.max(jnp.where(is_cls, pred, _NEG_BIG), axis=1, keepdims=True)
    e = jnp.exp(jnp.where(is_cls, pred - m, _NEG_BIG))       # 0 on non-class rows
    sm = e / jnp.sum(e, axis=1, keepdims=True)

    # Activated prediction per channel and its squared error.
    act = jnp.where(is_cls, sm, sig)
    d = act - tgt
    sq = d * d

    # Per-channel coefficient row: cls (0..9) / obj (14) / coord (10..13).
    coef = jnp.where(is_cls, CLS_COEF, jnp.where(is_conf, OBJ_COEF, COORD_COEF))

    # No-object term uses the RAW confidence logit (channel 14 only), as in Loss.py.
    d_raw = pred - tgt
    noobj = jnp.where(is_conf, NOOBJ_COEF * d_raw * d_raw, 0.0)

    # Single weighted slab, single full reduction -> scalar loss.
    total = conf * (coef * sq) + (1.0 - conf) * noobj
    out_ref[0, 0] = jnp.sum(total)


def _to_anchor_planes(x):
    """(1, 45, H, W) -> (3, 15, H*W) f32.  Pure reshape / bitcast, no pad."""
    return x.reshape(N_ANCHOR, C_PER_ANCHOR, HW).astype(jnp.float32)


@jax.jit
def anchor_loss(prediction, target):
    """prediction, target: NCHW float32 arrays of shape (1, 45, H, W)."""
    assert prediction.shape == (1, C, H, W)
    assert target.shape == (1, C, H, W)
    pred3 = _to_anchor_planes(prediction)
    tgt3 = _to_anchor_planes(target)

    n_elem = N_ANCHOR * C_PER_ANCHOR * HW
    out = pl.pallas_call(
        anchor_loss_kernel,
        out_shape=jax.ShapeDtypeStruct((1, 1), jnp.float32),
        in_specs=[
            pl.BlockSpec(memory_space=pltpu.MemorySpace.VMEM),
            pl.BlockSpec(memory_space=pltpu.MemorySpace.VMEM),
        ],
        out_specs=pl.BlockSpec(memory_space=pltpu.MemorySpace.SMEM),
        cost_estimate=pl.CostEstimate(
            flops=20 * n_elem,                 # ~a few 1e5 elementwise flops
            transcendentals=2 * n_elem,        # sigmoid + exp over the slab
            bytes_accessed=2 * n_elem * 4 + 4,
        ),
    )(pred3, tgt3)
    # TODO(synk): the PyTorch module prints the loss every PRINT_STEP calls;
    # that host-side side effect (and print_counter state) is left to the caller.
    return out[0, 0]


def anchor_loss_ref(prediction, target):
    """Pure-JAX reference mirroring the PyTorch forward (B=1)."""
    p = prediction.astype(jnp.float32)
    t = target.astype(jnp.float32)
    loss = jnp.float32(0.0)
    for a in (0, 15, 30):
        conf = t[:, a + 14, :, :]                              # (1, H, W)
        loss += COORD_COEF * jnp.sum(
            conf[:, None] * (jax.nn.sigmoid(p[:, a + 10:a + 12]) - t[:, a + 10:a + 12]) ** 2)
        loss += COORD_COEF * jnp.sum(
            conf[:, None] * (jax.nn.sigmoid(p[:, a + 12:a + 14]) - t[:, a + 12:a + 14]) ** 2)
        loss += CLS_COEF * jnp.sum(
            conf[:, None] * (jax.nn.softmax(p[:, a:a + 10], axis=1) - t[:, a:a + 10]) ** 2)
        loss += OBJ_COEF * jnp.sum(
            conf * (conf - jax.nn.sigmoid(p[:, a + 14])) ** 2)
        loss += NOOBJ_COEF * jnp.sum(
            (1.0 - conf) * (conf - p[:, a + 14]) ** 2)
    return loss


if __name__ == "__main__":
    key = jax.random.PRNGKey(0)
    kp, kt, km = jax.random.split(key, 3)

    # Deterministic synthetic inputs: B=1, C=45, H=W=16.
    prediction = jax.random.normal(kp, (1, C, H, W), dtype=jnp.float32)

    # Target: random box/class values in [0,1); conf channels are binary masks.
    target = jax.random.uniform(kt, (1, C, H, W), dtype=jnp.float32)
    conf_mask = (jax.random.uniform(km, (1, 3, H, W)) > 0.8).astype(jnp.float32)
    target = target.at[:, 14, :, :].set(conf_mask[:, 0])
    target = target.at[:, 29, :, :].set(conf_mask[:, 1])
    target = target.at[:, 44, :, :].set(conf_mask[:, 2])

    loss = anchor_loss(prediction, target)
    jax.block_until_ready(loss)

    # Exact reciprocal is used in the kernel softmax, so the tolerance is tight.
    ref = anchor_loss_ref(prediction, target)
    rel_err = abs(float(loss) - float(ref)) / max(abs(float(ref)), 1e-6)
    assert rel_err < 1e-4, f"mismatch: kernel={float(loss)} ref={float(ref)}"

    print("KERNEL_OK")
</pallas_src>

<mosaic_0001>
module attributes {stable_mosaic.version = 11 : i64} {
  func.func @anchor_loss_kernel(%arg0: memref<3x15x256xf32, #tpu.memory_space<vmem>>, %arg1: memref<3x15x256xf32, #tpu.memory_space<vmem>>, %arg2: memref<1x1xf32, #tpu.memory_space<smem>>) attributes {dimension_semantics = [], scalar_prefetch = 0 : i64, scratch_operands = 0 : i64, tpu.core_type = #tpu.core_type<tc>} {
    %c0 = arith.constant 0 : index
    %c0_0 = arith.constant 0 : index
    %c0_1 = arith.constant 0 : index
    %0 = vector.load %arg0[%c0, %c0_0, %c0_1] : memref<3x15x256xf32, #tpu.memory_space<vmem>>, vector<3x15x256xf32>
    %c0_2 = arith.constant 0 : index
    %c0_3 = arith.constant 0 : index
    %c0_4 = arith.constant 0 : index
    %1 = vector.load %arg1[%c0_2, %c0_3, %c0_4] : memref<3x15x256xf32, #tpu.memory_space<vmem>>, vector<3x15x256xf32>
    %c0_5 = arith.constant 0 : index
    %c14 = arith.constant 14 : index
    %c0_6 = arith.constant 0 : index
    %2 = vector.load %arg1[%c0_5, %c14, %c0_6] : memref<3x15x256xf32, #tpu.memory_space<vmem>>, vector<3x1x256xf32>
    %3 = tpu.iota {dimensions = array<i32: 1>} : vector<3x15x256xi32>
    %c10_i32 = arith.constant 10 : i32
    %4 = vector.broadcast %c10_i32 : i32 to vector<3x15x256xi32>
    %5 = arith.cmpi slt, %3, %4 : vector<3x15x256xi32>
    %c14_i32 = arith.constant 14 : i32
    %6 = vector.broadcast %c14_i32 : i32 to vector<3x15x256xi32>
    %7 = arith.cmpi eq, %3, %6 : vector<3x15x256xi32>
    %8 = arith.negf %0 : vector<3x15x256xf32>
    %9 = math.exp %8 : vector<3x15x256xf32>
    %cst = arith.constant 1.000000e+00 : f32
    %10 = vector.broadcast %cst : f32 to vector<3x15x256xf32>
    %11 = arith.addf %10, %9 : vector<3x15x256xf32>
    %12 = arith.divf %10, %11 : vector<3x15x256xf32>
    %cst_7 = arith.constant -1.000000e+30 : f32
    %13 = vector.broadcast %cst_7 : f32 to vector<3x15x256xf32>
    %14 = arith.select %5, %0, %13 : vector<3x15x256xi1>, vector<3x15x256xf32>
    %cst_8 = arith.constant dense<0xFF800000> : vector<3x256xf32>
    %15 = vector.multi_reduction <maximumf>, %14, %cst_8 [1] : vector<3x15x256xf32> to vector<3x256xf32>
    %16 = vector.shape_cast %15 : vector<3x256xf32> to vector<3x1x256xf32>
    %17 = vector.broadcast %16 : vector<3x1x256xf32> to vector<3x15x256xf32>
    %18 = arith.subf %0, %17 : vector<3x15x256xf32>
    %cst_9 = arith.constant -1.000000e+30 : f32
    %19 = vector.broadcast %cst_9 : f32 to vector<3x15x256xf32>
    %20 = arith.select %5, %18, %19 : vector<3x15x256xi1>, vector<3x15x256xf32>
    %21 = math.exp %20 : vector<3x15x256xf32>
    %cst_10 = arith.constant dense<0.000000e+00> : vector<3x256xf32>
    %22 = vector.multi_reduction <add>, %21, %cst_10 [1] : vector<3x15x256xf32> to vector<3x256xf32>
    %23 = vector.shape_cast %22 : vector<3x256xf32> to vector<3x1x256xf32>
    %24 = vector.broadcast %23 : vector<3x1x256xf32> to vector<3x15x256xf32>
    %25 = arith.divf %21, %24 : vector<3x15x256xf32>
    %26 = arith.select %5, %25, %12 : vector<3x15x256xi1>, vector<3x15x256xf32>
    %27 = arith.subf %26, %1 : vector<3x15x256xf32>
    %28 = arith.mulf %27, %27 : vector<3x15x256xf32>
    %cst_11 = arith.constant 5.000000e+00 : f32
    %cst_12 = arith.constant 5.000000e+00 : f32
    %29 = vector.broadcast %cst_11 : f32 to vector<3x15x256xf32>
    %30 = vector.broadcast %cst_12 : f32 to vector<3x15x256xf32>
    %31 = arith.select %7, %29, %30 : vector<3x15x256xi1>, vector<3x15x256xf32>
    %cst_13 = arith.constant 1.000000e+00 : f32
    %32 = vector.broadcast %cst_13 : f32 to vector<3x15x256xf32>
    %33 = arith.select %5, %32, %31 : vector<3x15x256xi1>, vector<3x15x256xf32>
    %34 = arith.subf %0, %1 : vector<3x15x256xf32>
    %cst_14 = arith.constant 5.000000e-01 : f32
    %35 = vector.broadcast %cst_14 : f32 to vector<3x15x256xf32>
    %36 = arith.mulf %35, %34 : vector<3x15x256xf32>
    %37 = arith.mulf %36, %34 : vector<3x15x256xf32>
    %cst_15 = arith.constant 0.000000e+00 : f32
    %38 = vector.broadcast %cst_15 : f32 to vector<3x15x256xf32>
    %39 = arith.select %7, %37, %38 : vector<3x15x256xi1>, vector<3x15x256xf32>
    %40 = arith.mulf %33, %28 : vector<3x15x256xf32>
    %41 = vector.broadcast %2 : vector<3x1x256xf32> to vector<3x15x256xf32>
    %42 = arith.mulf %41, %40 : vector<3x15x256xf32>
    %cst_16 = arith.constant 1.000000e+00 : f32
    %43 = vector.broadcast %cst_16 : f32 to vector<3x1x256xf32>
    %44 = arith.subf %43, %2 : vector<3x1x256xf32>
    %45 = vector.broadcast %44 : vector<3x1x256xf32> to vector<3x15x256xf32>
    %46 = arith.mulf %45, %39 : vector<3x15x256xf32>
    %47 = arith.addf %42, %46 : vector<3x15x256xf32>
    %48 = vector.shape_cast %47 : vector<3x15x256xf32> to vector<1x3x15x256xf32>
    %cst_17 = arith.constant dense<0.000000e+00> : vector<1xf32>
    %49 = vector.multi_reduction <add>, %48, %cst_17 [1, 2, 3] : vector<1x3x15x256xf32> to vector<1xf32>
    %50 = vector.shape_cast %49 : vector<1xf32> to vector<1x1x1x1xf32>
    %51 = vector.extract %50[0, 0, 0, 0] : f32 from vector<1x1x1x1xf32>
    %c0_18 = arith.constant 0 : index
    %c0_19 = arith.constant 0 : index
    %52 = memref.load %arg2[%c0_18, %c0_19] : memref<1x1xf32, #tpu.memory_space<smem>>
    memref.store %51, %arg2[%c0_18, %c0_19] : memref<1x1xf32, #tpu.memory_space<smem>>
    return
  }
}

</mosaic_0001>

<bundles_post_ra>
// kernel: anchor_loss.1
= control target key start
LH: loop header
LB: loop body
LE: loop exit
PB: predicated region body
PF: predicated region fallthrough
CT: control target
= control target key end

     0   :  { %7 = vsyncpa [#allocation3], 0  ;;  %v42_v0 = vlaneseq  ;;  %vm133_vm1 = vcmask 1046528   ;;  %s630_s5 = smov [#allocation2]   ;;  %s1042_s0 = inlined_call_operand.vmem [shape: f32[3,15,256], index: 0, kind: input, shape index: {}]   ;;  %s1043_s1 = inlined_call_operand.vmem [shape: f32[3,15,256], index: 1, kind: input, shape index: {}]   ;;  %s1044_s2 = inlined_call_operand.hbm [shape: f32[1,1], index: 2, kind: output, shape index: {}]  }
   0x1   :  { %v654_v3 = vld [vmem:[%s1042_s0 + $0x10] sm:$0x7f]  ;;  %v660_v4 = vld [vmem:[%s1042_s0 + $0x18] sm:$0x7f]  ;;  %v675_v7 = vld [vmem:[%s1042_s0] sm:$0xff] }
   0x2   :  { %v646_v1 = vshrl.u32 %v42_v0, 7  ;;  %v665_v5 = vld [vmem:[%s1042_s0 + $0x30] sm:$0x7f]  ;;  %v670_v6 = vld [vmem:[%s1042_s0 + $0x38] sm:$0x7f]  ;;  %v685_v9 = vld [vmem:[%s1042_s0 + $0x8] sm:$0xff] }
   0x3   :  { %v680_v8 = vld [vmem:[%s1042_s0 + $0x50] sm:$0x7f]  ;;  %v690_v10 = vld [vmem:[%s1042_s0 + $0x20] sm:$0xff]  ;;  %v695_v11 = vld [vmem:[%s1042_s0 + $0x58] sm:$0x7f] }
   0x4   :  { %v649_v2 = vadd.s32 8, %v646_v1  ;;  %v712_v16 = vld [vmem:[%s1042_s0 + $0x28] sm:$0xff]  ;;  %v721_v19 = vld [vmem:[%s1042_s0 + $0x40] sm:$0xff]  ;;  %v745_v38 = vld [vmem:[%s1043_s1 + $0x10] sm:$0x7f] }
   0x5   :  { %v732_v24 = vld [vmem:[%s1042_s0 + $0x48] sm:$0xff]  ;;  %v750_v42 = vld [vmem:[%s1043_s1 + $0x18] sm:$0x7f]  ;;  %v755_v46 = vld [vmem:[%s1043_s1 + $0x30] sm:$0x7f]  ;;  %v336_v55 = vsub.f32 %v654_v3, %v745_v38 }
   0x6   :  { %vm46_vm0 = vcmp.lt.s32.totalorder %v649_v2, 10  ;;  %v545_v47 = vmul.f32 -1.442695, %v654_v3  ;;  %v761_v51 = vld [vmem:[%s1043_s1 + $0x38] sm:$0x7f]  ;;  %v337_v59 = vsub.f32 %v660_v4, %v750_v42  ;;  %v340_v0 = vsub.f32 %v665_v5, %v755_v46 }
   0x7   :  { %v123_v12 = vsel %vm46_vm0, %v654_v3, -1e+30  ;;  %v124_v13 = vsel %vm46_vm0, %v660_v4, -1e+30  ;;  %v127_v14 = vsel %vm46_vm0, %v665_v5, -1e+30 }
   0x8   :  { %v128_v15 = vsel %vm46_vm0, %v670_v6, -1e+30  ;;  %v131_v17 = vsel %vm46_vm0, %v680_v8, -1e+30  ;;  %v134_v18 = vsel %vm133_vm1, %v123_v12, -inf  ;;  %v142_v22 = vsel %vm133_vm1, %v124_v13, -inf }
   0x9   :  { %v132_v20 = vsel %vm46_vm0, %v695_v11, -1e+30  ;;  %v135_v21 = vmax.f32 %v675_v7, %v134_v18  ;;  %v150_v23 = vsel %vm133_vm1, %v127_v14, -inf  ;;  %v143_v25 = vmax.f32 %v685_v9, %v142_v22  ;;  %v770_v60 = vld [vmem:[%s1043_s1 + $0x50] sm:$0x7f] }
   0xa   :  { %v151_v26 = vmax.f32 %v690_v10, %v150_v23  ;;  %v158_v27 = vsel %vm133_vm1, %v128_v15, -inf  ;;  %v166_v30 = vsel %vm133_vm1, %v131_v17, -inf  ;;  %v174_v34 = vsel %vm133_vm1, %v132_v20, -inf  ;;  %v779_v17 = vld [vmem:[%s1043_s1 + $0x58] sm:$0x7f] }
   0xb   :  { %v136_v28 = vrot.slane %v135_v21, 4  ;;  %v159_v29 = vmax.f32 %v712_v16, %v158_v27  ;;  %v144_v31 = vrot.slane %v143_v25, 4  ;;  %v167_v33 = vmax.f32 %v721_v19, %v166_v30 }
   0xc   :  { %v152_v32 = vrot.slane %v151_v26, 4  ;;  %v175_v37 = vmax.f32 %v732_v24, %v174_v34  ;;  %v341_v15 = vsub.f32 %v670_v6, %v761_v51  ;;  %v546_v18 = vmul.f32 -1.442695, %v660_v4 }
   0xd   :  { %v137_v35 = vmax.f32 %v135_v21, %v136_v28  ;;  %v160_v36 = vrot.slane %v159_v29, 4  ;;  %v145_v39 = vmax.f32 %v143_v25, %v144_v31  ;;  %v168_v41 = vrot.slane %v167_v33, 4 }
   0xe   :  { %v153_v40 = vmax.f32 %v151_v26, %v152_v32  ;;  %v176_v45 = vrot.slane %v175_v37, 4  ;;  %v348_v22 = vmul.f32 0.5, %v336_v55  ;;  %v344_v27 = vsub.f32 %v680_v8, %v770_v60 }
   0xf   :  { %v138_v43 = vrot.slane %v137_v35, 2  ;;  %v161_v44 = vmax.f32 %v159_v29, %v160_v36  ;;  %v146_v48 = vrot.slane %v145_v39, 2  ;;  %v169_v50 = vmax.f32 %v167_v33, %v168_v41 }
  0x10   :  { %v154_v49 = vrot.slane %v153_v40, 2  ;;  %v177_v54 = vmax.f32 %v175_v37, %v176_v45  ;;  %559 = vpow2.f32 %v545_v47  ;;  %v785_v30 = vsub.s32 0, %v646_v1 }
  0x11   :  { %v139_v52 = vmax.f32 %v137_v35, %v138_v43  ;;  %v162_v53 = vrot.slane %v161_v44, 2  ;;  %v147_v56 = vmax.f32 %v145_v39, %v146_v48  ;;  %v170_v58 = vrot.slane %v169_v50, 2 }
  0x12   :  { %v155_v57 = vmax.f32 %v153_v40, %v154_v49  ;;  %v178_v63 = vrot.slane %v177_v54, 2  ;;  %vm48_vm2 = vcmp.eq.s32.totalorder %v649_v2, 14  ;;  %v345_v32 = vsub.f32 %v695_v11, %v779_v17  ;;  %v32_v2 = vld [vmem:[%s1043_s1 + $0x40] sm:$0xff] }
  0x13   :  { %v140_v61 = vrot.slane %v139_v52, 1  ;;  %v163_v62 = vmax.f32 %v161_v44, %v162_v53  ;;  %v148_v12 = vrot.slane %v147_v56, 1  ;;  %v171_v14 = vmax.f32 %v169_v50, %v170_v58 }
  0x14   :  { %v156_v13 = vrot.slane %v155_v57, 1  ;;  %v179_v21 = vmax.f32 %v177_v54, %v178_v63  ;;  %v349_v33 = vmul.f32 0.5, %v337_v59  ;;  %561 = vpow2.f32 %v546_v18 }
  0x15   :  { %v164_v20 = vrot.slane %v163_v62, 1  ;;  %v141_v23 = vmax.f32 %v139_v52, %v140_v61  ;;  %v149_v25 = vmax.f32 %v147_v56, %v148_v12  ;;  %v172_v26 = vrot.slane %v171_v14, 1 }
  0x16   :  { %v157_v28 = vmax.f32 %v155_v57, %v156_v13  ;;  %v180_v31 = vrot.slane %v179_v21, 1  ;;  %v352_v35 = vmul.f32 0.5, %v340_v0  ;;  %v360_v36 = vmul.f32 %v348_v22, %v336_v55 }
  0x17   :  { %v165_v29 = vmax.f32 %v163_v62, %v164_v20  ;;  %v173_v34 = vmax.f32 %v171_v14, %v172_v26  ;;  %v184_v37 = vsub.f32 %v654_v3, %v141_v23  ;;  %v185_v39 = vsub.f32 %v660_v4, %v149_v25 }
  0x18   :  { %v353_v40 = vmul.f32 0.5, %v341_v15  ;;  %v356_v41 = vmul.f32 0.5, %v344_v27  ;;  %v182_v43 = vsub.f32 %v675_v7, %v141_v23  ;;  %v183_v44 = vsub.f32 %v685_v9, %v149_v25  ;;  %v833_v25 = vld [vmem:[%s1043_s1 + $0x56] ss:$8 sm:$0x3] }
  0x19   :  { %v188_v45 = vsub.f32 %v665_v5, %v157_v28  ;;  %v189_v47 = vsub.f32 %v670_v6, %v165_v29  ;;  %v181_v48 = vmax.f32 %v179_v21, %v180_v31  ;;  %v186_v49 = vsub.f32 %v690_v10, %v157_v28 }
  0x1a   :  { %v357_v50 = vmul.f32 0.5, %v345_v32  ;;  %v361_v52 = vmul.f32 %v349_v33, %v337_v59  ;;  %v187_v53 = vsub.f32 %v712_v16, %v165_v29  ;;  %v192_v3 = vsub.f32 %v680_v8, %v173_v34 }
  0x1b   :  { %v196_v4 = vsel %vm46_vm0, %v184_v37, -1e+30  ;;  %v197_v7 = vsel %vm46_vm0, %v185_v39, -1e+30  ;;  %v190_v9 = vsub.f32 %v721_v19, %v173_v34  ;;  %v191_v54 = vsub.f32 %v732_v24, %v181_v48 }
  0x1c   :  { %v200_v55 = vsel %vm46_vm0, %v188_v45, -1e+30  ;;  %v201_v10 = vsel %vm46_vm0, %v189_v47, -1e+30  ;;  %v206_v56 = vmul.f32 1.442695, %v182_v43  ;;  %v364_v58 = vmul.f32 %v352_v35, %v340_v0 }
  0x1d   :  { %v208_v16 = vmul.f32 1.442695, %v183_v44  ;;  %v210_v57 = vmul.f32 1.442695, %v196_v4  ;;  %v212_v59 = vmul.f32 1.442695, %v197_v7  ;;  %v365_v61 = vmul.f32 %v353_v40, %v341_v15  ;;  %v828_v23 = vpop.eup %559 }
  0x1e   :  { %v368_v62 = vmul.f32 %v356_v41, %v344_v27  ;;  %v369_v63 = vmul.f32 %v357_v50, %v345_v32  ;;  %v812_v19 = vld [vmem:[%s1043_s1 + $0x16] ss:$8 sm:$0x3]  ;;  %v193_v24 = vsub.f32 %v695_v11, %v181_v48  ;;  %v204_v12 = vsel %vm46_vm0, %v192_v3, -1e+30 }
  0x1f   :  { %563 = vpow2.f32 %v206_v56  ;;  %v214_v13 = vmul.f32 1.442695, %v186_v49  ;;  %v216_v14 = vmul.f32 1.442695, %v187_v53  ;;  %v218_v18 = vmul.f32 1.442695, %v200_v55 }
  0x20   :  { %565 = vpow2.f32 %v208_v16  ;;  %v220_v0 = vmul.f32 1.442695, %v201_v10  ;;  %v820_v15 = vld [vmem:[%s1043_s1 + $0x36] ss:$8 sm:$0x3]  ;;  %v372_v20 = vsel %vm48_vm2, %v360_v36, 0.0 }
  0x21   :  { %567 = vpow2.f32 %v210_v57  ;;  %v373_v21 = vsel %vm48_vm2, %v361_v52, 0.0  ;;  %v376_v22 = vsel %vm48_vm2, %v364_v58, 0.0  ;;  %v377_v26 = vsel %vm48_vm2, %v365_v61, 0.0  ;;  %v846_v33 = vpop.eup %561 }
  0x22   :  { %569 = vpow2.f32 %v212_v59  ;;  %v380_v27 = vsel %vm48_vm2, %v368_v62, 0.0  ;;  %v381_v28 = vsel %vm48_vm2, %v369_v63, 0.0  ;;  %v205_v29 = vsel %vm46_vm0, %v193_v24, -1e+30 }
  0x23   :  { %571 = vpow2.f32 %v214_v13  ;;  %v222_v31 = vmul.f32 1.442695, %v190_v9  ;;  %v844_v32 = vsub.s32 1, %v646_v1  ;;  %v224_v34 = vmul.f32 1.442695, %v191_v54 }
  0x24   :  { %573 = vpow2.f32 %v216_v14  ;;  %v439_v35 = vsub.f32 1.0, %v812_v19  ;;  %v440_v36 = vsub.f32 1.0, %v820_v15  ;;  %v226_v37 = vmul.f32 1.442695, %v204_v12 }
  0x25   :  { %575 = vpow2.f32 %v218_v18  ;;  %v441_v39 = vsub.f32 1.0, %v833_v25  ;;  %v228_v40 = vmul.f32 1.442695, %v205_v29  ;;  %v549_v1 = vmul.f32 -1.442695, %v665_v5 }
  0x26   :  { %577 = vpow2.f32 %v220_v0  ;;  %v852_v41 = vrot.slane %v439_v35, %v785_v30  ;;  %v550_v43 = vmul.f32 -1.442695, %v670_v6  ;;  %v857_v44 = vrot.slane %v439_v35, %v844_v32 }
  0x27   :  { %579 = vpow2.f32 %v222_v31  ;;  %v860_v45 = vrot.slane %v440_v36, %v785_v30  ;;  %v863_v47 = vrot.slane %v440_v36, %v844_v32  ;;  %v869_v49 = vrot.slane %v441_v39, %v785_v30 }
  0x28   :  { %581 = vpow2.f32 %v224_v34  ;;  %v866_v48 = vmul.f32 %v852_v41, %v372_v20  ;;  %v872_v5 = vrot.slane %v441_v39, %v844_v32  ;;  %v875_v6 = vmul.f32 %v857_v44, %v373_v21 }
  0x29   :  { %583 = vpow2.f32 %v226_v37  ;;  %1047 = vst [vmem:[#allocation5_spill] sm:$0xff] %v869_v49  ;;  %v878_v50 = vmul.f32 %v860_v45, %v376_v22  ;;  %v881_v52 = vmul.f32 %v863_v47, %v377_v26  ;;  %v884_v53 = vmul.f32 %v869_v49, %v380_v27 }
  0x2a   :  { %1048 = vst [vmem:[#allocation6_spill] sm:$0xff] %v872_v5  ;;  %585 = vpow2.f32 %v228_v40  ;;  %v887_v3 = vmul.f32 %v872_v5, %v381_v28  ;;  %v553_v7 = vmul.f32 -1.442695, %v680_v8  ;;  %v554_v54 = vmul.f32 -1.442695, %v695_v11 }
  0x2b   :  { %587 = vpow2.f32 %v549_v1  ;;  %v87_v26 = vadd.f32 1.0, %v828_v23  ;;  %v88_v23 = vadd.f32 1.0, %v846_v33 }
  0x2c   :  { %1049 = vst [vmem:[#allocation7_spill] sm:$0xff] %v887_v3  ;;  %v889_v4 = vpop.eup %563  ;;  %589 = vpow2.f32 %v550_v43 }
  0x2d   :  { %v892_v9 = vpop.eup %565  ;;  %591 = vpow2.f32 %v553_v7 }
  0x2e   :  { %v895_v55 = vpop.eup %567  ;;  %593 = vpow2.f32 %v554_v54 }
  0x2f   :  { %v897_v10 = vpop.eup %569  ;;  %v230_v56 = vsel %vm133_vm1, %v895_v55, 0.0  ;;  %595 = vrcp.f32 %v87_v26 }
  0x30   :  { %v901_v16 = vpop.eup %571  ;;  %v231_v57 = vadd.f32 %v889_v4, %v230_v56  ;;  %v238_v58 = vsel %vm133_vm1, %v897_v10, 0.0  ;;  %597 = vrcp.f32 %v88_v23 }
  0x31   :  { %v906_v8 = vpop.eup %573  ;;  %v239_v11 = vadd.f32 %v892_v9, %v238_v58 }
  0x32   :  { %v909_v59 = vpop.eup %575  ;;  %v232_v61 = vrot.slane %v231_v57, 4 }
  0x33   :  { %v911_v62 = vpop.eup %577  ;;  %v240_v63 = vrot.slane %v239_v11, 4  ;;  %v246_v24 = vsel %vm133_vm1, %v909_v59, 0.0 }
  0x34   :  { %v915_v12 = vpop.eup %579  ;;  %v233_v13 = vadd.f32 %v232_v61, %v231_v57  ;;  %v247_v14 = vadd.f32 %v901_v16, %v246_v24  ;;  %v254_v18 = vsel %vm133_vm1, %v911_v62, 0.0 }
  0x35   :  { %v920_v0 = vpop.eup %581  ;;  %v241_v20 = vadd.f32 %v240_v63, %v239_v11  ;;  %v255_v21 = vadd.f32 %v906_v8, %v254_v18 }
  0x36   :  { %v923_v22 = vpop.eup %583  ;;  %v234_v27 = vrot.slane %v233_v13, 2  ;;  %v248_v28 = vrot.slane %v247_v14, 4 }
  0x37   :  { %v926_v29 = vpop.eup %585  ;;  %v242_v31 = vrot.slane %v241_v20, 2  ;;  %v256_v34 = vrot.slane %v255_v21, 4  ;;  %v262_v35 = vsel %vm133_vm1, %v923_v22, 0.0 }
  0x38   :  { %v588_v36 = vpop.eup %587  ;;  %v235_v37 = vadd.f32 %v234_v27, %v233_v13  ;;  %v249_v39 = vadd.f32 %v248_v28, %v247_v14  ;;  %v263_v40 = vadd.f32 %v915_v12, %v262_v35  ;;  %v270_v1 = vsel %vm133_vm1, %v926_v29, 0.0 }
  0x39   :  { %v590_v43 = vpop.eup %589  ;;  %v243_v7 = vadd.f32 %v242_v31, %v241_v20  ;;  %v257_v54 = vadd.f32 %v256_v34, %v255_v21  ;;  %v271_v56 = vadd.f32 %v920_v0, %v270_v1  ;;  %v91_v61 = vadd.f32 1.0, %v588_v36 }
  0x3a   :  { %v236_v57 = vrot.slane %v235_v37, 1  ;;  %v250_v58 = vrot.slane %v249_v39, 2  ;;  %v264_v11 = vrot.slane %v263_v40, 4  ;;  %v92_v14 = vadd.f32 1.0, %v590_v43  ;;  %v592_v35 = vpop.eup %591 }
  0x3b   :  { %v244_v63 = vrot.slane %v243_v7, 1  ;;  %v258_v24 = vrot.slane %v257_v54, 2  ;;  %v272_v13 = vrot.slane %v271_v56, 4  ;;  %v594_v21 = vpop.eup %593  ;;  %v95_v36 = vadd.f32 1.0, %v592_v35 }
  0x3c   :  { %v237_v18 = vadd.f32 %v236_v57, %v235_v37  ;;  %v251_v27 = vadd.f32 %v250_v58, %v249_v39  ;;  %v265_v28 = vadd.f32 %v264_v11, %v263_v40  ;;  %v96_v43 = vadd.f32 1.0, %v594_v21  ;;  %v24_v58 = vld [vmem:[%s1043_s1] sm:$0xff] }
  0x3d   :  { %v245_v5 = vadd.f32 %v244_v63, %v243_v7  ;;  %v259_v33 = vadd.f32 %v258_v24, %v257_v54  ;;  %v273_v20 = vadd.f32 %v272_v13, %v271_v56  ;;  %v596_v56 = vpop.eup %595 }
  0x3e   :  { %v252_v31 = vrot.slane %v251_v27, 1  ;;  %v266_v34 = vrot.slane %v265_v28, 2  ;;  %599 = vrcp.f32 %v237_v18 }
  0x3f   :  { %v260_v26 = vrot.slane %v259_v33, 1  ;;  %v274_v1 = vrot.slane %v273_v20, 2  ;;  %601 = vrcp.f32 %v245_v5  ;;  %v598_v5 = vpop.eup %597 }
  0x40   :  { %603 = vrcp.f32 %v91_v61  ;;  %v253_v49 = vadd.f32 %v252_v31, %v251_v27  ;;  %v267_v3 = vadd.f32 %v266_v34, %v265_v28  ;;  %v629_v28 = vmov 5.0  }
  0x41   :  { %605 = vrcp.f32 %v92_v14  ;;  %v261_v37 = vadd.f32 %v260_v26, %v259_v33  ;;  %v275_v39 = vadd.f32 %v274_v1, %v273_v20  ;;  %v960_v20 = vrot.slane %v820_v15, %v785_v30 }
  0x42   :  { %v268_v40 = vrot.slane %v267_v3, 1  ;;  %607 = vrcp.f32 %v253_v49  ;;  %v966_v1 = vrot.slane %v820_v15, %v844_v32 }
  0x43   :  { %v276_v23 = vrot.slane %v275_v39, 1  ;;  %609 = vrcp.f32 %v261_v37  ;;  %v972_v37 = vrot.slane %v833_v25, %v785_v30 }
  0x44   :  { %611 = vrcp.f32 %v95_v36  ;;  %v269_v7 = vadd.f32 %v268_v40, %v267_v3  ;;  %v25_v3 = vld [vmem:[%s1043_s1 + $0x8] sm:$0xff] }
  0x45   :  { %613 = vrcp.f32 %v96_v43  ;;  %v277_v54 = vadd.f32 %v276_v23, %v275_v39 }
  0x46   :  { %615 = vrcp.f32 %v269_v7 }
  0x47   :  { %617 = vrcp.f32 %v277_v54  ;;  %v475_v54 = vmul.f32 0.0, %v852_v41 }
  0x4b   :  { %v600_v57 = vpop.eup %599 }
  0x4c   :  { %v602_v11 = vpop.eup %601  ;;  %v279_v61 = vmul.f32 %v600_v57, %v889_v4  ;;  %v282_v49 = vmul.f32 %v600_v57, %v895_v55  ;;  %v949_v4 = vsel %vm46_vm0, 1.0, %v629_v28  ;;  %v400_v55 = vrot.slane %v812_v19, %v785_v30 }
  0x4d   :  { %v604_v63 = vpop.eup %603  ;;  %v281_v24 = vmul.f32 %v602_v11, %v892_v9  ;;  %v283_v13 = vmul.f32 %v602_v11, %v897_v10  ;;  %v404_v10 = vrot.slane %v812_v19, %v844_v32 }
  0x4e   :  { %v606_v14 = vpop.eup %605  ;;  %v298_v18 = vsel %vm46_vm0, %v282_v49, %v596_v56  ;;  %v308_v27 = vsub.f32 %v279_v61, %v24_v58  ;;  %v476_v58 = vmul.f32 0.0, %v857_v44 }
  0x4f   :  { %v608_v35 = vpop.eup %607  ;;  %v299_v33 = vsel %vm46_vm0, %v283_v13, %v598_v5  ;;  %v310_v9 = vsub.f32 %v298_v18, %v745_v38  ;;  %v309_v34 = vsub.f32 %v281_v24, %v25_v3  ;;  %v29_v5 = vld [vmem:[%s1043_s1 + $0x28] sm:$0xff] }
  0x50   :  { %v610_v21 = vpop.eup %609  ;;  %v288_v31 = vmul.f32 %v608_v35, %v909_v59  ;;  %v311_v26 = vsub.f32 %v299_v33, %v750_v42  ;;  %v285_v38 = vmul.f32 %v608_v35, %v901_v16  ;;  %v28_v59 = vld [vmem:[%s1043_s1 + $0x20] sm:$0xff]  ;;  %v320_v15 = vmul.f32 %v308_v27, %v308_v27 }
  0x51   :  { %v612_v36 = vpop.eup %611  ;;  %v289_v43 = vmul.f32 %v610_v21, %v911_v62  ;;  %v322_v19 = vmul.f32 %v310_v9, %v310_v9  ;;  %v981_v16 = vrot.slane %v833_v25, %v844_v32  ;;  %v287_v23 = vmul.f32 %v610_v21, %v906_v8 }
  0x52   :  { %v614_v39 = vpop.eup %613  ;;  %v302_v42 = vsel %vm46_vm0, %v288_v31, %v604_v63  ;;  %v323_v40 = vmul.f32 %v311_v26, %v311_v26  ;;  %v321_v32 = vmul.f32 %v309_v34, %v309_v34  ;;  %v312_v11 = vsub.f32 %v285_v38, %v28_v59 }
  0x53   :  { %v616_v62 = vpop.eup %615  ;;  %v303_v30 = vsel %vm46_vm0, %v289_v43, %v606_v14  ;;  %v314_v7 = vsub.f32 %v302_v42, %v755_v46  ;;  %v384_v46 = vmul.f32 %v949_v4, %v322_v19  ;;  %v427_v3 = vmul.f32 %v400_v55, %v320_v15 }
  0x54   :  { %v618_v56 = vpop.eup %617  ;;  %v294_v57 = vmul.f32 %v616_v62, %v923_v22  ;;  %v315_v25 = vsub.f32 %v303_v30, %v761_v51  ;;  %v385_v63 = vmul.f32 %v949_v4, %v323_v40  ;;  %v313_v51 = vsub.f32 %v287_v23, %v29_v5  ;;  %v1050_v23 = vld [vmem:[#allocation7_spill] sm:$0xff] }
  0x55   :  { %v295_v8 = vmul.f32 %v618_v56, %v926_v29  ;;  %v326_v61 = vmul.f32 %v314_v7, %v314_v7  ;;  %v291_v29 = vmul.f32 %v616_v62, %v915_v12  ;;  %v428_v18 = vmul.f32 %v404_v10, %v321_v32 }
  0x56   :  { %v306_v41 = vsel %vm46_vm0, %v294_v57, %v612_v36  ;;  %v327_v49 = vmul.f32 %v315_v25, %v315_v25  ;;  %v324_v27 = vmul.f32 %v312_v11, %v312_v11  ;;  %v429_v35 = vmul.f32 %v400_v55, %v384_v46 }
  0x57   :  { %v307_v22 = vsel %vm46_vm0, %v295_v8, %v614_v39  ;;  %v318_v24 = vsub.f32 %v306_v41, %v770_v60  ;;  %v388_v44 = vmul.f32 %v949_v4, %v326_v61  ;;  %v430_v33 = vmul.f32 %v404_v10, %v385_v63 }
  0x58   :  { %v319_v13 = vsub.f32 %v307_v22, %v779_v17  ;;  %v389_v14 = vmul.f32 %v949_v4, %v327_v49  ;;  %v293_v9 = vmul.f32 %v618_v56, %v920_v0  ;;  %v479_v12 = vmul.f32 0.0, %v860_v45  ;;  %v33_v17 = vld [vmem:[%s1043_s1 + $0x48] sm:$0xff] }
  0x59   :  { %v330_v28 = vmul.f32 %v318_v24, %v318_v24  ;;  %v433_v21 = vmul.f32 %v960_v20, %v388_v44  ;;  %v325_v31 = vmul.f32 %v313_v51, %v313_v51  ;;  %v480_v10 = vmul.f32 0.0, %v863_v47 }
  0x5a   :  { %v331_v60 = vmul.f32 %v319_v13, %v319_v13  ;;  %v434_v55 = vmul.f32 %v966_v1, %v389_v14  ;;  %v487_v36 = vadd.f32 %v475_v54, %v427_v3  ;;  %v488_v0 = vadd.f32 %v476_v58, %v428_v18  ;;  %v1052_v58 = vld [vmem:[#allocation6_spill] sm:$0xff] }
  0x5b   :  { %v392_v34 = vmul.f32 %v949_v4, %v330_v28  ;;  %v489_v38 = vadd.f32 %v866_v48, %v429_v35  ;;  %v316_v43 = vsub.f32 %v291_v29, %v32_v2  ;;  %v431_v45 = vmul.f32 %v960_v20, %v324_v27 }
  0x5c   :  { %v393_v26 = vmul.f32 %v949_v4, %v331_v60  ;;  %v490_v39 = vadd.f32 %v875_v6, %v430_v33  ;;  %v317_v59 = vsub.f32 %v293_v9, %v33_v17  ;;  %v493_v15 = vadd.f32 %v878_v50, %v433_v21 }
  0x5d   :  { %v437_v19 = vmul.f32 %v972_v37, %v392_v34  ;;  %v494_v47 = vadd.f32 %v881_v52, %v434_v55  ;;  %v432_v4 = vmul.f32 %v966_v1, %v325_v31  ;;  %v499_v62 = vadd.f32 %v488_v0, %v487_v36  ;;  %v1051_v52 = vld [vmem:[#allocation5_spill] sm:$0xff] }
  0x5e   :  { %v438_v42 = vmul.f32 %v981_v16, %v393_v26  ;;  %v500_v48 = vsel %vm133_vm1, %v489_v38, 0.0  ;;  %v502_v30 = vsel %vm133_vm1, %v490_v39, 0.0  ;;  %v328_v7 = vmul.f32 %v316_v43, %v316_v43 }
  0x5f   :  { %v497_v40 = vadd.f32 %v884_v53, %v437_v19  ;;  %v491_v6 = vadd.f32 %v479_v12, %v431_v45  ;;  %v501_v54 = vadd.f32 %v500_v48, %v499_v62  ;;  %v329_v56 = vmul.f32 %v317_v59, %v317_v59 }
  0x60   :  { %v498_v20 = vadd.f32 %v1050_v23, %v438_v42  ;;  %v492_v5 = vadd.f32 %v480_v10, %v432_v4  ;;  %v435_v50 = vmul.f32 %v972_v37, %v328_v7  ;;  %v483_v25 = vmul.f32 0.0, %v1051_v52 }
  0x61   :  { %v503_v57 = vadd.f32 %v502_v30, %v501_v54  ;;  %v506_v53 = vsel %vm133_vm1, %v493_v15, 0.0  ;;  %v436_v32 = vmul.f32 %v981_v16, %v329_v56  ;;  %v484_v8 = vmul.f32 0.0, %v1052_v58 }
  0x62   :  { %v508_v61 = vsel %vm133_vm1, %v494_v47, 0.0  ;;  %v495_v46 = vadd.f32 %v483_v25, %v435_v50  ;;  %v512_v22 = vsel %vm133_vm1, %v497_v40, 0.0  ;;  %v514_v51 = vsel %vm133_vm1, %v498_v20, 0.0 }
  0x63   :  { %v504_v1 = vadd.f32 %v503_v57, %v491_v6  ;;  %v496_v49 = vadd.f32 %v484_v8, %v436_v32 }
  0x65   :  { %v505_v11 = vadd.f32 %v504_v1, %v492_v5 }
  0x67   :  { %v507_v41 = vadd.f32 %v506_v53, %v505_v11 }
  0x69   :  { %v509_v63 = vadd.f32 %v508_v61, %v507_v41 }
  0x6b   :  { %v510_v3 = vadd.f32 %v509_v63, %v495_v46 }
  0x6d   :  { %v511_v37 = vadd.f32 %v510_v3, %v496_v49 }
  0x6f   :  { %v513_v24 = vadd.f32 %v512_v22, %v511_v37 }
  0x71   :  { %v515_v44 = vadd.f32 %v514_v51, %v513_v24 }
  0x73   :  { %516 = vadd.xlane.f32.xlu0 %v515_v44 }
  0xfc   :  { %v517_v29 = vpop.xlane.xlu0 %516 }
  0xfd   :  { %v518_v16 = vrot.slane %v517_v29, 4 }
  0xff   :  { %v519_v13 = vadd.f32 %v518_v16, %v517_v29 }
 0x101   :  { %v520_v14 = vrot.slane %v519_v13, 2 }
 0x103   :  { %v521_v18 = vadd.f32 %v520_v14, %v519_v13 }
 0x105   :  { %v522_v27 = vrot.slane %v521_v18, 1 }
 0x107   :  { %v523_v28 = vadd.f32 %v522_v27, %v521_v18 }
 0x109   :  { %555 = vpush %v523_v28 }
 0x13a   :  { %s556_s1 = spop %555 }
 0x13b   :  { %526 = sst [smem:[#allocation2]] %s556_s1 }
 0x13c   :  { %534 = dma.smem_to_hbm %s630_s5, 16, %s1044_s2, [#allocation3]  }
 0x13d   :  { %627 = dma.done.wait [#allocation3], 16  }
 0x13e   :  { %628 = vsyncadd [#allocation3], 4294967280 }
 0x13f   :  { %538 = sfence }
 0x140   :  { %539 = vsyncpa [#allocation3], 1 }

</bundles_post_ra>
